<compile_context>
chip_gen: v7x
topology: tpu7x:2x2x1
jax: 0.10.0
libtpu: 0.0.40
codegen_flags: <defaults>
</compile_context>

<pallas_src>
import jax
import jax.numpy as jnp
from jax.experimental import pallas as pl
from jax.experimental.pallas import tpu as pltpu


_LANES = 1024                       # lane-dense last dim (multiple of 128)
_MAX_BLOCK_ROWS = 1024              # (1024, 1024) f32 tile = 4 MiB per buffer
_CHUNK_1D = _MAX_BLOCK_ROWS * _LANES
_VMEM_LIMIT = 32 * 1024 * 1024      # covers in+out double buffers on v5e/v6e/v7x


def _q_sym_kernel(scalars_ref, x_ref, o_ref):
    # scalars_ref: SMEM f32[3] = [alpha, n_lv, step = alpha / n_lv]
    alpha = scalars_ref[0]
    n_lv = scalars_ref[1]
    step = scalars_ref[2]
    x = x_ref[...].astype(jnp.float32)
    # Exact lsq_forward (sym) formulation: round(clamp(x/alpha,-1,1)*n_lv)*(alpha/n_lv)
    # jnp.round is round-half-to-even, matching torch.round.
    q = jnp.round(jnp.clip(x / alpha, -1.0, 1.0) * n_lv) * step
    o_ref[...] = q.astype(o_ref.dtype)


def _choose_block_rows(rows):
    """Pick a sublane-aligned row-block: big enough to amortize per-step overhead,
    small enough that the grid has >= 4 steps (v7x: 2 TCs x >= 2 blocks)."""
    if rows <= 8:
        return rows                      # full dim (always a legal block shape)
    tgt = -(-rows // 4)                  # cdiv(rows, 4): aim for >= 4 grid steps
    tgt = ((tgt + 7) // 8) * 8           # round up to a multiple of 8 sublanes
    return min(tgt, _MAX_BLOCK_ROWS)


def _lsq_sym_pallas_2d(x2, scalars, out_dtype):
    """Main path: element count divisible by _LANES -> (rows, 1024) streaming."""
    rows, lanes = x2.shape
    block_rows = _choose_block_rows(rows)
    return pl.pallas_call(
        _q_sym_kernel,
        out_shape=jax.ShapeDtypeStruct((rows, lanes), out_dtype),
        grid=(pl.cdiv(rows, block_rows),),
        in_specs=[
            pl.BlockSpec(memory_space=pltpu.SMEM),                 # [alpha, n_lv, step]
            pl.BlockSpec((block_rows, lanes), lambda i: (i, 0)),   # x tile
        ],
        out_specs=pl.BlockSpec((block_rows, lanes), lambda i: (i, 0)),
        compiler_params=pltpu.CompilerParams(
            dimension_semantics=("parallel",),
            vmem_limit_bytes=_VMEM_LIMIT,
        ),
    )(scalars, x2)


def _lsq_sym_pallas_1d(flat, scalars, out_dtype):
    """Ragged path: element count NOT divisible by _LANES. Single pallas_call on
    the flat 1-D array (no slice / pad / concatenate): a full-array block for
    small n, otherwise fixed chunks with the ragged last block masked by the
    grid boundary handling. HBM traffic stays at ~1 read + 1 write."""
    n = flat.shape[0]
    if n <= _CHUNK_1D:
        block = n                        # block == full dim: always legal
    else:
        block = _CHUNK_1D                # multiple of 1024; last block is ragged
    return pl.pallas_call(
        _q_sym_kernel,
        out_shape=jax.ShapeDtypeStruct((n,), out_dtype),
        grid=(pl.cdiv(n, block),),
        in_specs=[
            pl.BlockSpec(memory_space=pltpu.SMEM),
            pl.BlockSpec((block,), lambda i: (i,)),
        ],
        out_specs=pl.BlockSpec((block,), lambda i: (i,)),
        compiler_params=pltpu.CompilerParams(
            dimension_semantics=("parallel",),
            vmem_limit_bytes=_VMEM_LIMIT,
        ),
    )(scalars, flat)


def _lsq_sym(x, alpha, n_lv):
    """Symmetric LSQ fake-quant, elementwise, via a single pallas_call."""
    orig_shape = x.shape
    orig_dtype = x.dtype

    alpha_f = jnp.asarray(alpha, jnp.float32).reshape(())
    n_lv_f = jnp.asarray(n_lv, jnp.float32).reshape(())
    scalars = jnp.stack([alpha_f, n_lv_f, alpha_f / n_lv_f])

    n = x.size
    if n == 0:
        return x

    flat = x.reshape(-1)  # row-major flatten; layout-preserving (no copy)
    if n % _LANES == 0:
        out = _lsq_sym_pallas_2d(flat.reshape(-1, _LANES), scalars, orig_dtype)
    else:
        out = _lsq_sym_pallas_1d(flat, scalars, orig_dtype)
    return out.reshape(orig_shape)


class QSym:
    """JAX port of nipq.Q_Sym (forward only)."""

    def __init__(self):
        self.quant = False
        self.noise = True
        self.is_stochastic = True
        self.is_discretize = True
        self.training = False
        # Deterministic parameter init, matching the PyTorch __init__:
        self.bit = jnp.zeros((1,), jnp.float32)        # Parameter(Tensor(1).zero_())
        self.alpha = jnp.full((1,), 3.0, jnp.float32)  # Parameter(Tensor(1).fill_(3))

    def __call__(self, x):
        if self.quant is False:
            return x
        if self.training and self.noise:
            # TODO(synk): training+noise branch of noise_quant (torch.histc +
            # torch.multinomial data-dependent stochastic noise) has no clean
            # Pallas equivalent; raise instead of silently diverging.
            raise NotImplementedError(
                "Q_Sym training+noise path is not implemented in the Pallas port")
        # noise_quant, eval / discretized path, sym=True:
        bit = 2.0 + jax.nn.sigmoid(self.bit) * 12.0
        bit = jnp.round(bit)                    # STE round: forward value
        alpha = jax.nn.softplus(self.alpha)
        n_lv = 2.0 ** (jnp.round(bit) - 1.0) - 1.0
        return _lsq_sym(x, alpha[0], n_lv[0])


if __name__ == "__main__":
    key = jax.random.PRNGKey(0)
    # NCHW input, small shapes: batch=2, channels=4, spatial=16
    x = jax.random.normal(key, (2, 4, 16, 16), dtype=jnp.float32) * 2.0

    mod = QSym()

    # Path 1: quant=False -> identity (the module default forward).
    y_id = jax.block_until_ready(mod(x))
    assert jnp.array_equal(y_id, x), "identity path mismatch"

    # Path 2: quant=True (eval) -> LSQ symmetric fake-quant via the Pallas kernel.
    mod.quant = True

    alpha_ref = jax.nn.softplus(jnp.float32(3.0))
    n_lv_ref = jnp.float32(2.0 ** 7 - 1.0)

    def ref_fn(v):
        vq = jnp.clip(v.astype(jnp.float32) / alpha_ref, -1.0, 1.0) * n_lv_ref
        return (jnp.round(vq) * (alpha_ref / n_lv_ref)).astype(v.dtype)

    # (a) element count divisible by 1024 -> 2D tiled path.
    y_q = jax.block_until_ready(mod(x))
    assert jnp.allclose(y_q, ref_fn(x), atol=1e-6), "quant path mismatch"

    # (b) multi-step 2D grid with a ragged final row-block (20 rows, 8-row blocks).
    x2 = jax.random.normal(jax.random.PRNGKey(0), (5, 4, 32, 32), dtype=jnp.float32) * 2.0
    y2 = jax.block_until_ready(mod(x2))
    assert jnp.allclose(y2, ref_fn(x2), atol=1e-6), "2D ragged row-block mismatch"

    # (c) element count NOT divisible by 1024 -> single-pallas_call 1D path
    #     (no slice / pad / concatenate).
    x3 = jax.random.normal(jax.random.PRNGKey(0), (2, 4, 16, 15), dtype=jnp.float32) * 2.0
    y3 = jax.block_until_ready(mod(x3))
    assert jnp.allclose(y3, ref_fn(x3), atol=1e-6), "ragged (1D) path mismatch"

    print("KERNEL_OK")
</pallas_src>

<mosaic_0001>
module attributes {stable_mosaic.version = 11 : i64} {
  func.func @_q_sym_kernel(%arg0: i32, %arg1: memref<3xf32, #tpu.memory_space<smem>>, %arg2: memref<2x1024xf32, #tpu.memory_space<vmem>>, %arg3: memref<2x1024xf32, #tpu.memory_space<vmem>>) attributes {dimension_semantics = [#tpu.dimension_semantics<parallel>], iteration_bounds = array<i64: 1>, scalar_prefetch = 0 : i64, scratch_operands = 0 : i64, tpu.core_type = #tpu.core_type<tc>, window_params = [{transform_indices = @transform_0, window_bounds = array<i64: 3>}, {transform_indices = @transform_1, window_bounds = array<i64: 2, 1024>}, {transform_indices = @transform_2, window_bounds = array<i64: 2, 1024>}]} {
    %c0 = arith.constant 0 : index
    %0 = memref.load %arg1[%c0] : memref<3xf32, #tpu.memory_space<smem>>
    %c1 = arith.constant 1 : index
    %1 = memref.load %arg1[%c1] : memref<3xf32, #tpu.memory_space<smem>>
    %c2 = arith.constant 2 : index
    %2 = memref.load %arg1[%c2] : memref<3xf32, #tpu.memory_space<smem>>
    %c0_0 = arith.constant 0 : index
    %c0_1 = arith.constant 0 : index
    %3 = vector.load %arg2[%c0_0, %c0_1] : memref<2x1024xf32, #tpu.memory_space<vmem>>, vector<2x1024xf32>
    %4 = vector.broadcast %0 : f32 to vector<2x1024xf32>
    %5 = arith.divf %3, %4 : vector<2x1024xf32>
    %cst = arith.constant -1.000000e+00 : f32
    %cst_2 = arith.constant 1.000000e+00 : f32
    %6 = vector.broadcast %cst : f32 to vector<2x1024xf32>
    %7 = arith.maximumf %6, %5 : vector<2x1024xf32>
    %8 = vector.broadcast %cst_2 : f32 to vector<2x1024xf32>
    %9 = arith.minimumf %8, %7 : vector<2x1024xf32>
    %10 = vector.broadcast %1 : f32 to vector<2x1024xf32>
    %11 = arith.mulf %9, %10 : vector<2x1024xf32>
    %12 = math.roundeven %11 : vector<2x1024xf32>
    %13 = vector.broadcast %2 : f32 to vector<2x1024xf32>
    %14 = arith.mulf %12, %13 : vector<2x1024xf32>
    %c0_3 = arith.constant 0 : index
    %c0_4 = arith.constant 0 : index
    %15 = vector.load %arg3[%c0_3, %c0_4] : memref<2x1024xf32, #tpu.memory_space<vmem>>, vector<2x1024xf32>
    tpu.vector_store %arg3[%c0_3, %c0_4], %14 {strides = array<i32>} : memref<2x1024xf32, #tpu.memory_space<vmem>>, vector<2x1024xf32>,
    return
  }
  func.func @transform_0(%arg0: i32) -> i32 {
    %c0_i32 = arith.constant 0 : i32
    %c0_i32_0 = arith.constant 0 : i32
    return %c0_i32 : i32
  }
  func.func @transform_1(%arg0: i32) -> (i32, i32) {
    %c0_i32 = arith.constant 0 : i32
    %c0_i32_0 = arith.constant 0 : i32
    return %arg0, %c0_i32 : i32, i32
  }
  func.func @transform_2(%arg0: i32) -> (i32, i32) {
    %c0_i32 = arith.constant 0 : i32
    %c0_i32_0 = arith.constant 0 : i32
    return %arg0, %c0_i32 : i32, i32
  }
}

</mosaic_0001>

<bundles_post_ra>
// kernel: tpu_custom_call.1
= control target key start
LH: loop header
LB: loop body
LE: loop exit
PB: predicated region body
PF: predicated region fallthrough
CT: control target
= control target key end

     0   :  { %7 = vsyncpa [#allocation5], 0  ;;  %s199_s0 = inlined_call_operand.hbm [shape: f32[3], index: 0, kind: input, shape index: {}]   ;;  %s200_s1 = inlined_call_operand.hbm [shape: f32[2,1024], index: 1, kind: input, shape index: {}]   ;;  %s201_s2 = inlined_call_operand.hbm [shape: f32[2,1024], index: 2, kind: output, shape index: {}]  }
   0x1   :  { %8 = vsyncpa [#allocation3], 0 }
   0x2   :  { %9 = vsyncpa [#allocation4], 0  ;;  %s85_s11 = scalar_lea.hbm %s199_s0, 16 }
   0x3   :  { %p86_p0 = scmp.ne.s32.totalorder %s199_s0, %s85_s11  ;;  %p89_p1 = scmp.lt.u32.totalorder %s85_s11, %s199_s0 }
   0x5   :  { %p91_p2 = pnand %p89_p1, %p86_p0 }
   0x7   :  { %94 = shalt.err (!%p91_p2)
}
   0x8   :  { %s145_s16 = smov [#allocation2]   ;;  %s146_s19 = smov [#allocation6]  }
   0x9   :  { %17 = dma.hbm_to_smem %s199_s0, 16, %s145_s16, [#allocation5]  }
   0xa   :  { %s24_s20 = sshll.u32 %s146_s19, 4  ;;  %s95_s23 = scalar_lea.hbm %s200_s1, 256  ;;  %s25_s20 = int_to_ptr.vmem [resolvable:$true] %s24_s20 }
   0xb   :  { %p96_p3 = scmp.ne.s32.totalorder %s200_s1, %s95_s23  ;;  %p99_p4 = scmp.lt.u32.totalorder %s95_s23, %s200_s1 }
   0xd   :  { %p101_p5 = pnand %p99_p4, %p96_p3 }
   0xf   :  { %104 = shalt.err (!%p101_p5)
}
  0x10   :  { %s105_s28 = scalar_lea.vmem %s25_s20, 256  ;;  %p110_p7 = scmp.lt.s32.totalorder %s25_s20, %s25_s20 }
  0x11   :  { %p106_p6 = scmp.ne.s32.totalorder %s25_s20, %s105_s28  ;;  %p111_p8 = scmp.lt.s32.totalorder %s105_s28, %s105_s28 }
  0x13   :  { %p112_p9 = por %p111_p8, %p110_p7 }
  0x15   :  { %p113_p10 = pnand %p112_p9, %p106_p6 }
  0x17   :  { %116 = shalt.err (!%p113_p10)
}
  0x18   :  { %27 = dma.hbm_to_vmem [thread:$0]  %s200_s1, 256, %s25_s20, [#allocation3]  }
  0x19   :  { %139 = dma.done.wait [#allocation5], 16  }
  0x1a   :  { %140 = vsyncadd [#allocation5], 4294967280 }
  0x1b   :  { %141 = dma.done.wait [#allocation3], 256  }
  0x1c   :  { %142 = vsyncadd [#allocation3], 4294967040 }
  0x1d   :  { %34 = sfence }
  0x1e   :  { %s35_s30 = sld [smem:[#allocation2]]  ;;  %s74_s3 = sld [smem:[#allocation2 + $0x1]]  ;;  %v38_v1 = vld [vmem:[#allocation6] sm:$0xff]  ;;  %v39_v2 = vld [vmem:[#allocation6 + $0x8] sm:$0xff] }
  0x1f   :  { %s75_s4 = sld [smem:[#allocation2 + $0x2]]  ;;  %s147_s1 = smov [#allocation7]  }
  0x20   :  { %s64_s5 = sshll.u32 %s147_s1, 4  ;;  %s65_s5 = int_to_ptr.vmem [resolvable:$true] %s64_s5 }
  0x21   :  { %s117_s6 = scalar_lea.vmem %s65_s5, 256  ;;  %p122_p12 = scmp.lt.s32.totalorder %s65_s5, %s65_s5 }
  0x22   :  { %p118_p11 = scmp.ne.s32.totalorder %s65_s5, %s117_s6  ;;  %p123_p13 = scmp.lt.s32.totalorder %s117_s6, %s117_s6 }
  0x24   :  { %v40_v0 = vstv %s35_s30  ;;  %v48_v6 = vstv %s74_s3  ;;  %p124_p0 = por %p123_p13, %p122_p12 }
  0x25   :  { %83 = vrcp.f32 %v40_v0  ;;  %v53_v11 = vstv %s75_s4 }
  0x26   :  { %p125_p1 = pnand %p124_p0, %p118_p11 }
  0x2f   :  { %v84_v3 = vpop.eup %83 }
  0x30   :  { %v42_v4 = vmul.f32 %v84_v3, %v38_v1  ;;  %v43_v5 = vmul.f32 %v84_v3, %v39_v2 }
  0x32   :  { %v76_v7 = vclamps-f32 %v42_v4, 1.0  ;;  %v77_v8 = vclamps-f32 %v43_v5, 1.0 }
  0x34   :  { %v49_v9 = vmul.f32 %v76_v7, %v48_v6  ;;  %v50_v10 = vmul.f32 %v77_v8, %v48_v6 }
  0x36   :  { %v78_v12 = vround.rtne.f32 %v49_v9  ;;  %v79_v13 = vround.rtne.f32 %v50_v10 }
  0x38   :  { %v54_v14 = vmul.f32 %v78_v12, %v53_v11  ;;  %v55_v15 = vmul.f32 %v79_v13, %v53_v11 }
  0x3a   :  { %56 = vst [vmem:[#allocation7] sm:$0xff] %v54_v14  ;;  %57 = vst [vmem:[#allocation7 + $0x8] sm:$0xff] %v55_v15 }
  0x3b   :  { %128 = shalt.err (!%p125_p1)
}
  0x3c   :  { %s129_s9 = scalar_lea.hbm %s201_s2, 256 }
  0x3d   :  { %p130_p2 = scmp.ne.s32.totalorder %s201_s2, %s129_s9  ;;  %p133_p3 = scmp.lt.u32.totalorder %s129_s9, %s201_s2 }
  0x3f   :  { %p135_p4 = pnand %p133_p3, %p130_p2 }
  0x41   :  { %138 = shalt.err (!%p135_p4)
}
  0x42   :  { %67 = dma.vmem_to_hbm [thread:$0]  %s65_s5, 256, %s201_s2, [#allocation4]  }
  0x43   :  { %143 = dma.done.wait [#allocation4], 256  }
  0x44   :  { %144 = vsyncadd [#allocation4], 4294967040 }
  0x45   :  { %71 = vsyncpa [#allocation3], 1 }
  0x46   :  { %72 = vsyncpa [#allocation4], 1 }
  0x47   :  { %73 = vsyncpa [#allocation5], 1 }

</bundles_post_ra>
